<compile_context>
chip_gen: v5e
topology: v5e:2x2
jax: 0.10.0
libtpu: 0.0.40
codegen_flags: <defaults>
</compile_context>

<pallas_src>
import functools

import jax
import jax.numpy as jnp
from jax.experimental import pallas as pl
from jax.experimental.pallas import tpu as pltpu


def _patch_embed_kernel(x_ref, w_ref, b_ref, o_ref):
    # x_ref: (tm, K) bf16 patches, w_ref: (K, tn) bf16, b_ref: (1, tn) f32,
    # o_ref: (tm, tn).  Single MXU matmul per tile, f32 accumulate, f32 bias.
    acc = jnp.dot(x_ref[...], w_ref[...], preferred_element_type=jnp.float32)
    o_ref[...] = (acc + b_ref[...]).astype(o_ref.dtype)


def _choose_tile(dim: int, preferred: int, align: int) -> int:
    """Largest tile <= `preferred` that is a multiple of `align` and evenly
    divides `dim`; falls back to the full dimension (always layout-legal)."""
    if dim <= preferred:
        return dim
    t = preferred - (preferred % align)
    while t >= align:
        if dim % t == 0:
            return t
        t -= align
    return dim


def prepare_patch_embedding_params(weight, bias):
    """One-time preprocessing of the PyTorch Conv2d parameters (hoisted out of
    the per-call path).

    weight: [E, C, P, P] -> w_mat: [K, E] in bf16 (MXU-native operand)
    bias:   [E]          -> b_mat: [1, E] in f32  (added after f32 accumulate)
    """
    E = weight.shape[0]
    K = weight.shape[1] * weight.shape[2] * weight.shape[3]
    w_mat = jnp.asarray(weight).reshape(E, K).T.astype(jnp.bfloat16)
    b_mat = jnp.asarray(bias).reshape(1, E).astype(jnp.float32)
    return w_mat, b_mat


@functools.partial(jax.jit, static_argnums=3)
def patch_embedding(x, w_mat, b_mat, patch_size):
    """x: [B, C, H, W] (NCHW); w_mat: [K, E]; b_mat: [1, E].
    Returns [B, N, E] with N = (H/P)*(W/P) — identical to the PyTorch
    forward (conv -> flatten(2) -> permute(0, 2, 1))."""
    B, C, H, W = x.shape
    P = patch_size
    Hn, Wn = H // P, W // P
    N = Hn * Wn
    K = C * P * P
    E = w_mat.shape[1]
    M = B * N

    # Patch extraction: flatten each patch in (c, ph, pw) order to match the
    # [E, C, P, P] conv-weight layout.  Layout plumbing only — eligible for
    # fusion into the kernel's input DMA (allow_input_fusion below).
    patches = x.reshape(B, C, Hn, P, Wn, P)
    patches = jnp.transpose(patches, (0, 2, 4, 1, 3, 5))  # [B, Hn, Wn, C, P, P]
    patches = patches.reshape(M, K).astype(jnp.bfloat16)  # bf16 MXU operand

    # Tile over M (patch rows) and E (embedding lanes); K stays resident.
    # Production DiffusionGS sizes (M in the thousands, E=768..1152) give
    # tm=512, tn=256; the tiny demo shapes fall back to full-dim blocks.
    tm = _choose_tile(M, preferred=512, align=8)
    tn = _choose_tile(E, preferred=256, align=128)
    grid = (M // tm, E // tn)

    out = pl.pallas_call(
        _patch_embed_kernel,
        out_shape=jax.ShapeDtypeStruct((M, E), x.dtype),
        grid_spec=pltpu.PrefetchScalarGridSpec(
            num_scalar_prefetch=0,
            grid=grid,
            in_specs=[
                pl.BlockSpec((tm, K), lambda i, j: (i, 0)),   # patches tile
                pl.BlockSpec((K, tn), lambda i, j: (0, j)),   # weight tile
                pl.BlockSpec((1, tn), lambda i, j: (0, j)),   # bias tile
            ],
            out_specs=pl.BlockSpec((tm, tn), lambda i, j: (i, j)),
        ),
        compiler_params=pltpu.CompilerParams(
            dimension_semantics=("parallel", "parallel"),
            allow_input_fusion=[True, False, False],
        ),
    )(patches, w_mat, b_mat)

    return out.reshape(B, N, E)


if __name__ == "__main__":
    # Small shapes consistent with the module: B=2, C=4, H=W=16, patch=4, E=32.
    B, C, H, W = 2, 4, 16, 16
    P = 4
    E = 32

    key = jax.random.PRNGKey(0)
    kx, kw, kb = jax.random.split(key, 3)
    x = jax.random.normal(kx, (B, C, H, W), dtype=jnp.float32)
    weight = jax.random.normal(kw, (E, C, P, P), dtype=jnp.float32) * 0.02
    bias = jax.random.normal(kb, (E,), dtype=jnp.float32) * 0.02

    # One-time parameter preprocessing (hoisted out of the forward path).
    w_mat, b_mat = prepare_patch_embedding_params(weight, bias)

    out = patch_embedding(x, w_mat, b_mat, P)
    jax.block_until_ready(out)

    # Reference: XLA conv with the same bf16 rounding of the matmul operands
    # (the kernel feeds the MXU bf16 inputs and accumulates in f32).
    x_bf = x.astype(jnp.bfloat16).astype(jnp.float32)
    w_bf = weight.astype(jnp.bfloat16).astype(jnp.float32)
    ref = jax.lax.conv_general_dilated(
        x_bf, w_bf, window_strides=(P, P), padding="VALID",
        dimension_numbers=("NCHW", "OIHW", "NCHW"),
    ) + bias.reshape(1, E, 1, 1)
    ref = ref.reshape(B, E, -1).transpose(0, 2, 1)  # [B, N, E]

    assert out.shape == (B, (H // P) * (W // P), E)
    assert jnp.allclose(out, ref, atol=1e-3, rtol=1e-3), float(
        jnp.max(jnp.abs(out - ref)))

    print("KERNEL_OK")
</pallas_src>

<mosaic_0001>
module attributes {stable_mosaic.version = 11 : i64} {
  func.func @_patch_embed_kernel(%arg0: i32, %arg1: i32, %arg2: memref<32x64xbf16, #tpu.memory_space<vmem>>, %arg3: memref<64x32xbf16, #tpu.memory_space<vmem>>, %arg4: memref<1x32xf32, #tpu.memory_space<vmem>>, %arg5: memref<32x32xf32, #tpu.memory_space<vmem>>) attributes {dimension_semantics = [#tpu.dimension_semantics<parallel>, #tpu.dimension_semantics<parallel>], iteration_bounds = array<i64: 1, 1>, scalar_prefetch = 0 : i64, scratch_operands = 0 : i64, tpu.core_type = #tpu.core_type<tc>, window_params = [{transform_indices = @transform_0, window_bounds = array<i64: 32, 64>}, {transform_indices = @transform_1, window_bounds = array<i64: 64, 32>}, {transform_indices = @transform_2, window_bounds = array<i64: 1, 32>}, {transform_indices = @transform_3, window_bounds = array<i64: 32, 32>}]} {
    %c0 = arith.constant 0 : index
    %c0_0 = arith.constant 0 : index
    %0 = vector.load %arg2[%c0, %c0_0] : memref<32x64xbf16, #tpu.memory_space<vmem>>, vector<32x64xbf16>
    %c0_1 = arith.constant 0 : index
    %c0_2 = arith.constant 0 : index
    %1 = vector.load %arg3[%c0_1, %c0_2] : memref<64x32xbf16, #tpu.memory_space<vmem>>, vector<64x32xbf16>
    %cst = arith.constant dense<0.000000e+00> : vector<32x32xf32>
    %2 = tpu.matmul %0, %1, %cst {dimension_numbers = #tpu.dot_dimension_numbers<[1], [0], [0], [1], [0, 0, 1, 1], [], []>} : vector<32x64xbf16>, vector<64x32xbf16>, vector<32x32xf32> -> vector<32x32xf32>
    %c0_3 = arith.constant 0 : index
    %c0_4 = arith.constant 0 : index
    %3 = vector.load %arg4[%c0_3, %c0_4] : memref<1x32xf32, #tpu.memory_space<vmem>>, vector<1x32xf32>
    %4 = vector.broadcast %3 : vector<1x32xf32> to vector<32x32xf32>
    %5 = arith.addf %2, %4 : vector<32x32xf32>
    %c0_5 = arith.constant 0 : index
    %c0_6 = arith.constant 0 : index
    %6 = vector.load %arg5[%c0_5, %c0_6] : memref<32x32xf32, #tpu.memory_space<vmem>>, vector<32x32xf32>
    tpu.vector_store %arg5[%c0_5, %c0_6], %5 {strides = array<i32>} : memref<32x32xf32, #tpu.memory_space<vmem>>, vector<32x32xf32>,
    return
  }
  func.func @transform_0(%arg0: i32, %arg1: i32) -> (i32, i32) {
    %c0_i32 = arith.constant 0 : i32
    %c0_i32_0 = arith.constant 0 : i32
    return %arg0, %c0_i32 : i32, i32
  }
  func.func @transform_1(%arg0: i32, %arg1: i32) -> (i32, i32) {
    %c0_i32 = arith.constant 0 : i32
    %c0_i32_0 = arith.constant 0 : i32
    return %c0_i32, %arg1 : i32, i32
  }
  func.func @transform_2(%arg0: i32, %arg1: i32) -> (i32, i32) {
    %c0_i32 = arith.constant 0 : i32
    %c0_i32_0 = arith.constant 0 : i32
    return %c0_i32, %arg1 : i32, i32
  }
  func.func @transform_3(%arg0: i32, %arg1: i32) -> (i32, i32) {
    %c0_i32 = arith.constant 0 : i32
    return %arg0, %arg1 : i32, i32
  }
}

</mosaic_0001>

<bundles_post_ra>
// kernel: patch_embedding.1
= control target key start
LH: loop header
LB: loop body
LE: loop exit
PB: predicated region body
PF: predicated region fallthrough
CT: control target
= control target key end

     0   :  { %s232_s0 = inlined_call_operand.vmem [shape: bf16[32,64], index: 0, kind: input, shape index: {}]   ;;  %s233_s1 = inlined_call_operand.vmem [shape: bf16[64,32], index: 1, kind: input, shape index: {}]   ;;  %s234_s2 = inlined_call_operand.vmem [shape: f32[1,32], index: 2, kind: input, shape index: {}]   ;;  %s235_s3 = inlined_call_operand.hbm [shape: f32[32,32], index: 3, kind: output, shape index: {}]  }
   0x1   :  { %v146_v0 = vld [vmem:[%s233_s1 + $0x18] sm:$0xff]  ;;  %v145_v1 = vld [vmem:[%s233_s1 + $0x10] sm:$0xff] }
   0x2   :  { %77 = vmatpush.bf16.msra.mxu0 %v146_v0  ;;  %147 = vmatpush.bf16.msra.mxu1 %v146_v0 }
   0x3   :  { %8 = vsyncpa [#allocation3], 0  ;;  %v144_v2 = vld [vmem:[%s233_s1 + $0x8] sm:$0xff]  ;;  %v143_v3 = vld [vmem:[%s233_s1] sm:$0xff]  ;;  %vm66_vm0 = vcmask 523264   ;;  %vm92_vm1 = vcmask 261120  }
   0x4   :  { %v141_v4 = vld [vmem:[%s232_s0] sm:$0xff]  ;;  %v142_v5 = vld [vmem:[%s232_s0 + $0x8] sm:$0xff]  ;;  %s181_s1 = smov [#allocation2]   ;;  %s103_s28 = sshll.u32 %s235_s3, 4  ;;  %s104_s28 = int_to_ptr.hbm [resolvable:$true] %s103_s28 }
   0x5   :  { %v154_v6 = vld [vmem:[%s234_s2] ss:$0 sm:$0xff]  ;;  %s101_s0 = sshll.u32 %s181_s1, 4  ;;  %s182_s2 = smov 128   ;;  %s102_s0 = int_to_ptr.vmem [resolvable:$true] %s101_s0 }
   0x6   :  { %78 = vmatpush.bf16.msra.mxu0 %v145_v1  ;;  %148 = vmatpush.bf16.msra.mxu1 %v145_v1  ;;  %s183_s29 = smov 8  }
   0xa   :  { %79 = vmatpush.bf16.msra.mxu0 %v144_v2  ;;  %149 = vmatpush.bf16.msra.mxu1 %v144_v2 }
   0xe   :  { %80 = vmatpush.bf16.msra.mxu0 %v143_v3  ;;  %150 = vmatpush.bf16.msra.mxu1 %v143_v3 }
  0x11   :  { %139 = vmatmul.msk.bf16.vlgmr.msra.gmra.mxu0 %vm66_vm0, %v141_v4  ;;  %140 = vmatmul.msk.bf16.vlgmr.msra.gmra.mxu1 %vm66_vm0, %v142_v5 }
  0x8e   :  { %v82_v7 = vpop.f32.mrf.mxu0  ;;  %v87_v8 = vpop.f32.mrf.mxu1 }
  0x8f   :  { %v83_v9 = vadd.f32 %v154_v6, %v82_v7  ;;  %v88_v10 = vadd.f32 %v154_v6, %v87_v8 }
  0x91   :  { %93 = vst.msk [vmem:[#allocation2] sm:$0xff] %vm92_vm1, %v83_v9 }
  0x92   :  { %95 = vst.msk [vmem:[#allocation2 + $0x10] sm:$0xff] %vm92_vm1, %v88_v10 }
  0x96   :  { %v84_v11 = vpop.f32.mrf.mxu0  ;;  %v89_v12 = vpop.f32.mrf.mxu1 }
  0x97   :  { %v85_v13 = vadd.f32 %v154_v6, %v84_v11  ;;  %v90_v14 = vadd.f32 %v154_v6, %v89_v12 }
  0x99   :  { %94 = vst.msk [vmem:[#allocation2 + $0x8] sm:$0xff] %vm92_vm1, %v85_v13 }
  0x9a   :  { %96 = vst.msk [vmem:[#allocation2 + $0x18] sm:$0xff] %vm92_vm1, %v90_v14 }
  0x9b   :  { %109 = dma.vmem_to_hbm [thread:$0]  %s102_s0, 512, %s104_s28, [#allocation3], %s182_s2, %s182_s2, %s183_s29  }
  0x9c   :  { %179 = dma.done.wait [#allocation3], 512  }
  0x9d   :  { %180 = vsyncadd [#allocation3], 4294966784 }
  0x9e   :  { %114 = vsyncpa [#allocation3], 1 }

</bundles_post_ra>
